<compile_context>
chip_gen: v7x
topology: tpu7x:2x2x1
jax: 0.10.0
libtpu: 0.0.40
codegen_flags: <defaults>
</compile_context>

<pallas_src>
import jax
import jax.numpy as jnp
from jax.experimental import pallas as pl
from jax.experimental.pallas import tpu as pltpu


def _outconv_kernel(x_ref, w_ref, b_ref, o_ref):
    # x_ref: VMEM (C_in, tm)   -- lane-dense spatial tile
    # w_ref: SMEM (C_out, C_in) float32 scalars
    # b_ref: SMEM (C_out,)     float32 scalars
    # o_ref: VMEM (C_out, tm)  -- lane-dense spatial tile
    c_out, c_in = w_ref.shape
    x = x_ref[...].astype(jnp.float32)          # load tile once, compute in f32
    for co in range(c_out):                     # fully unrolled: c_out*c_in VPU MACs
        acc = x[0:1, :] * w_ref[co, 0] + b_ref[co]
        for ci in range(1, c_in):
            acc = acc + x[ci:ci + 1, :] * w_ref[co, ci]
        o_ref[co:co + 1, :] = acc.astype(o_ref.dtype)


def out_conv(x_nchw, weight, bias, *, max_tile=4096):
    """1x1 Conv2d forward (PyTorch OutConv semantics).

    Args:
      x_nchw: (N, C_in, H, W) input.
      weight: (C_out, C_in, 1, 1) conv weight (PyTorch layout).
      bias:   (C_out,) conv bias.
    Returns:
      (N, C_out, H, W) output, same dtype as x.
    """
    N, C_in, H, W = x_nchw.shape
    C_out = weight.shape[0]
    M = H * W

    # Free layout views (no HBM traffic): NCHW already has spatial contiguous last.
    x_flat = x_nchw.reshape(N, C_in, M)
    w_mat = weight.reshape(C_out, C_in).astype(jnp.float32)
    b_vec = bias.reshape(C_out).astype(jnp.float32)

    # Lane-dense M tile: either the full spatial extent or a big multiple of 128.
    if M <= max_tile:
        tm = M                              # equals full dim -> always a legal block
    else:
        tm = (max_tile // 128) * 128        # large multiple of 128; cdiv handles tail

    grid = (N, pl.cdiv(M, tm))

    y_flat = pl.pallas_call(
        _outconv_kernel,
        out_shape=jax.ShapeDtypeStruct((N, C_out, M), x_nchw.dtype),
        grid=grid,
        in_specs=[
            # pixel tile: batch dim squeezed, channels on sublanes, spatial on lanes
            pl.BlockSpec((None, C_in, tm), lambda n, j: (n, 0, j)),
            # tiny weight / bias as SMEM scalars (read with static indices)
            pl.BlockSpec(memory_space=pltpu.MemorySpace.SMEM),
            pl.BlockSpec(memory_space=pltpu.MemorySpace.SMEM),
        ],
        out_specs=pl.BlockSpec((None, C_out, tm), lambda n, j: (n, 0, j)),
        compiler_params=pltpu.CompilerParams(
            dimension_semantics=("parallel", "parallel")),
        cost_estimate=pl.CostEstimate(
            flops=2 * N * M * C_in * C_out,
            transcendentals=0,
            bytes_accessed=4 * (N * M * C_in + N * M * C_out
                                + C_in * C_out + C_out)),
    )(x_flat, w_mat, b_vec)

    return y_flat.reshape(N, C_out, H, W)


if __name__ == "__main__":
    # Shapes consistent with the module: in_channels=4, out_channels=3,
    # batch=2, spatial=16.
    N, C_in, C_out, H, W = 2, 4, 3, 16, 16

    key = jax.random.PRNGKey(0)
    kx, kw, kb = jax.random.split(key, 3)

    x = jax.random.normal(kx, (N, C_in, H, W), dtype=jnp.float32)
    # Deterministic "Kaiming-ish" init for the Conv2d(k=1) parameters.
    fan_in = C_in * 1 * 1
    bound = 1.0 / (fan_in ** 0.5)
    weight = jax.random.uniform(kw, (C_out, C_in, 1, 1), jnp.float32,
                                minval=-bound, maxval=bound)
    bias = jax.random.uniform(kb, (C_out,), jnp.float32,
                              minval=-bound, maxval=bound)

    y = out_conv(x, weight, bias)
    y = jax.block_until_ready(y)

    # Reference: pure-JAX 1x1 conv (einsum over channels + bias).
    y_ref = jnp.einsum("nihw,oi->nohw", x, weight.reshape(C_out, C_in)) \
        + bias.reshape(1, C_out, 1, 1)

    assert y.shape == (N, C_out, H, W)
    assert jnp.allclose(y, y_ref, atol=1e-5, rtol=1e-5)
    print("KERNEL_OK")
</pallas_src>

<mosaic_0001>
module attributes {stable_mosaic.version = 11 : i64} {
  func.func @_outconv_kernel(%arg0: i32, %arg1: i32, %arg2: memref<1x4x256xf32, #tpu.memory_space<vmem>>, %arg3: memref<3x4xf32, #tpu.memory_space<smem>>, %arg4: memref<3xf32, #tpu.memory_space<smem>>, %arg5: memref<1x3x256xf32, #tpu.memory_space<vmem>>) attributes {dimension_semantics = [#tpu.dimension_semantics<parallel>, #tpu.dimension_semantics<parallel>], iteration_bounds = array<i64: 2, 1>, scalar_prefetch = 0 : i64, scratch_operands = 0 : i64, tpu.core_type = #tpu.core_type<tc>, window_params = [{transform_indices = @transform_0, window_bounds = array<i64: 1, 4, 256>}, {transform_indices = @transform_1, window_bounds = array<i64: 3, 4>}, {transform_indices = @transform_2, window_bounds = array<i64: 3>}, {transform_indices = @transform_3, window_bounds = array<i64: 1, 3, 256>}]} {
    %c0 = arith.constant 0 : index
    %c0_0 = arith.constant 0 : index
    %c0_1 = arith.constant 0 : index
    %0 = vector.load %arg2[%c0, %c0_0, %c0_1] : memref<1x4x256xf32, #tpu.memory_space<vmem>>, vector<1x4x256xf32>
    %1 = vector.shape_cast %0 : vector<1x4x256xf32> to vector<4x256xf32>
    %2 = vector.extract_strided_slice %1 {offsets = [0, 0], sizes = [1, 256], strides = [1, 1]} : vector<4x256xf32> to vector<1x256xf32>
    %c0_2 = arith.constant 0 : index
    %c0_3 = arith.constant 0 : index
    %3 = memref.load %arg3[%c0_2, %c0_3] : memref<3x4xf32, #tpu.memory_space<smem>>
    %4 = vector.broadcast %3 : f32 to vector<1x256xf32>
    %5 = arith.mulf %2, %4 : vector<1x256xf32>
    %c0_4 = arith.constant 0 : index
    %6 = memref.load %arg4[%c0_4] : memref<3xf32, #tpu.memory_space<smem>>
    %7 = vector.broadcast %6 : f32 to vector<1x256xf32>
    %8 = arith.addf %5, %7 : vector<1x256xf32>
    %9 = vector.extract_strided_slice %1 {offsets = [1, 0], sizes = [1, 256], strides = [1, 1]} : vector<4x256xf32> to vector<1x256xf32>
    %c0_5 = arith.constant 0 : index
    %c1 = arith.constant 1 : index
    %10 = memref.load %arg3[%c0_5, %c1] : memref<3x4xf32, #tpu.memory_space<smem>>
    %11 = vector.broadcast %10 : f32 to vector<1x256xf32>
    %12 = arith.mulf %9, %11 : vector<1x256xf32>
    %13 = arith.addf %8, %12 : vector<1x256xf32>
    %14 = vector.extract_strided_slice %1 {offsets = [2, 0], sizes = [1, 256], strides = [1, 1]} : vector<4x256xf32> to vector<1x256xf32>
    %c0_6 = arith.constant 0 : index
    %c2 = arith.constant 2 : index
    %15 = memref.load %arg3[%c0_6, %c2] : memref<3x4xf32, #tpu.memory_space<smem>>
    %16 = vector.broadcast %15 : f32 to vector<1x256xf32>
    %17 = arith.mulf %14, %16 : vector<1x256xf32>
    %18 = arith.addf %13, %17 : vector<1x256xf32>
    %19 = vector.extract_strided_slice %1 {offsets = [3, 0], sizes = [1, 256], strides = [1, 1]} : vector<4x256xf32> to vector<1x256xf32>
    %c0_7 = arith.constant 0 : index
    %c3 = arith.constant 3 : index
    %20 = memref.load %arg3[%c0_7, %c3] : memref<3x4xf32, #tpu.memory_space<smem>>
    %21 = vector.broadcast %20 : f32 to vector<1x256xf32>
    %22 = arith.mulf %19, %21 : vector<1x256xf32>
    %23 = arith.addf %18, %22 : vector<1x256xf32>
    %c0_8 = arith.constant 0 : index
    %c0_9 = arith.constant 0 : index
    %c0_10 = arith.constant 0 : index
    %24 = vector.load %arg5[%c0_8, %c0_9, %c0_10] : memref<1x3x256xf32, #tpu.memory_space<vmem>>, vector<1x1x256xf32>
    %25 = vector.shape_cast %24 : vector<1x1x256xf32> to vector<1x256xf32>
    %26 = vector.shape_cast %23 : vector<1x256xf32> to vector<1x1x256xf32>
    tpu.vector_store %arg5[%c0_8, %c0_9, %c0_10], %26 {strides = array<i32>} : memref<1x3x256xf32, #tpu.memory_space<vmem>>, vector<1x1x256xf32>,
    %27 = vector.extract_strided_slice %1 {offsets = [0, 0], sizes = [1, 256], strides = [1, 1]} : vector<4x256xf32> to vector<1x256xf32>
    %c1_11 = arith.constant 1 : index
    %c0_12 = arith.constant 0 : index
    %28 = memref.load %arg3[%c1_11, %c0_12] : memref<3x4xf32, #tpu.memory_space<smem>>
    %29 = vector.broadcast %28 : f32 to vector<1x256xf32>
    %30 = arith.mulf %27, %29 : vector<1x256xf32>
    %c1_13 = arith.constant 1 : index
    %31 = memref.load %arg4[%c1_13] : memref<3xf32, #tpu.memory_space<smem>>
    %32 = vector.broadcast %31 : f32 to vector<1x256xf32>
    %33 = arith.addf %30, %32 : vector<1x256xf32>
    %34 = vector.extract_strided_slice %1 {offsets = [1, 0], sizes = [1, 256], strides = [1, 1]} : vector<4x256xf32> to vector<1x256xf32>
    %c1_14 = arith.constant 1 : index
    %c1_15 = arith.constant 1 : index
    %35 = memref.load %arg3[%c1_14, %c1_15] : memref<3x4xf32, #tpu.memory_space<smem>>
    %36 = vector.broadcast %35 : f32 to vector<1x256xf32>
    %37 = arith.mulf %34, %36 : vector<1x256xf32>
    %38 = arith.addf %33, %37 : vector<1x256xf32>
    %39 = vector.extract_strided_slice %1 {offsets = [2, 0], sizes = [1, 256], strides = [1, 1]} : vector<4x256xf32> to vector<1x256xf32>
    %c1_16 = arith.constant 1 : index
    %c2_17 = arith.constant 2 : index
    %40 = memref.load %arg3[%c1_16, %c2_17] : memref<3x4xf32, #tpu.memory_space<smem>>
    %41 = vector.broadcast %40 : f32 to vector<1x256xf32>
    %42 = arith.mulf %39, %41 : vector<1x256xf32>
    %43 = arith.addf %38, %42 : vector<1x256xf32>
    %44 = vector.extract_strided_slice %1 {offsets = [3, 0], sizes = [1, 256], strides = [1, 1]} : vector<4x256xf32> to vector<1x256xf32>
    %c1_18 = arith.constant 1 : index
    %c3_19 = arith.constant 3 : index
    %45 = memref.load %arg3[%c1_18, %c3_19] : memref<3x4xf32, #tpu.memory_space<smem>>
    %46 = vector.broadcast %45 : f32 to vector<1x256xf32>
    %47 = arith.mulf %44, %46 : vector<1x256xf32>
    %48 = arith.addf %43, %47 : vector<1x256xf32>
    %c0_20 = arith.constant 0 : index
    %c1_21 = arith.constant 1 : index
    %c0_22 = arith.constant 0 : index
    %49 = vector.load %arg5[%c0_20, %c1_21, %c0_22] : memref<1x3x256xf32, #tpu.memory_space<vmem>>, vector<1x1x256xf32>
    %50 = vector.shape_cast %49 : vector<1x1x256xf32> to vector<1x256xf32>
    %51 = vector.shape_cast %48 : vector<1x256xf32> to vector<1x1x256xf32>
    tpu.vector_store %arg5[%c0_20, %c1_21, %c0_22], %51 {strides = array<i32>} : memref<1x3x256xf32, #tpu.memory_space<vmem>>, vector<1x1x256xf32>,
    %52 = vector.extract_strided_slice %1 {offsets = [0, 0], sizes = [1, 256], strides = [1, 1]} : vector<4x256xf32> to vector<1x256xf32>
    %c2_23 = arith.constant 2 : index
    %c0_24 = arith.constant 0 : index
    %53 = memref.load %arg3[%c2_23, %c0_24] : memref<3x4xf32, #tpu.memory_space<smem>>
    %54 = vector.broadcast %53 : f32 to vector<1x256xf32>
    %55 = arith.mulf %52, %54 : vector<1x256xf32>
    %c2_25 = arith.constant 2 : index
    %56 = memref.load %arg4[%c2_25] : memref<3xf32, #tpu.memory_space<smem>>
    %57 = vector.broadcast %56 : f32 to vector<1x256xf32>
    %58 = arith.addf %55, %57 : vector<1x256xf32>
    %59 = vector.extract_strided_slice %1 {offsets = [1, 0], sizes = [1, 256], strides = [1, 1]} : vector<4x256xf32> to vector<1x256xf32>
    %c2_26 = arith.constant 2 : index
    %c1_27 = arith.constant 1 : index
    %60 = memref.load %arg3[%c2_26, %c1_27] : memref<3x4xf32, #tpu.memory_space<smem>>
    %61 = vector.broadcast %60 : f32 to vector<1x256xf32>
    %62 = arith.mulf %59, %61 : vector<1x256xf32>
    %63 = arith.addf %58, %62 : vector<1x256xf32>
    %64 = vector.extract_strided_slice %1 {offsets = [2, 0], sizes = [1, 256], strides = [1, 1]} : vector<4x256xf32> to vector<1x256xf32>
    %c2_28 = arith.constant 2 : index
    %c2_29 = arith.constant 2 : index
    %65 = memref.load %arg3[%c2_28, %c2_29] : memref<3x4xf32, #tpu.memory_space<smem>>
    %66 = vector.broadcast %65 : f32 to vector<1x256xf32>
    %67 = arith.mulf %64, %66 : vector<1x256xf32>
    %68 = arith.addf %63, %67 : vector<1x256xf32>
    %69 = vector.extract_strided_slice %1 {offsets = [3, 0], sizes = [1, 256], strides = [1, 1]} : vector<4x256xf32> to vector<1x256xf32>
    %c2_30 = arith.constant 2 : index
    %c3_31 = arith.constant 3 : index
    %70 = memref.load %arg3[%c2_30, %c3_31] : memref<3x4xf32, #tpu.memory_space<smem>>
    %71 = vector.broadcast %70 : f32 to vector<1x256xf32>
    %72 = arith.mulf %69, %71 : vector<1x256xf32>
    %73 = arith.addf %68, %72 : vector<1x256xf32>
    %c0_32 = arith.constant 0 : index
    %c2_33 = arith.constant 2 : index
    %c0_34 = arith.constant 0 : index
    %74 = vector.load %arg5[%c0_32, %c2_33, %c0_34] : memref<1x3x256xf32, #tpu.memory_space<vmem>>, vector<1x1x256xf32>
    %75 = vector.shape_cast %74 : vector<1x1x256xf32> to vector<1x256xf32>
    %76 = vector.shape_cast %73 : vector<1x256xf32> to vector<1x1x256xf32>
    tpu.vector_store %arg5[%c0_32, %c2_33, %c0_34], %76 {strides = array<i32>} : memref<1x3x256xf32, #tpu.memory_space<vmem>>, vector<1x1x256xf32>,
    return
  }
  func.func @transform_0(%arg0: i32, %arg1: i32) -> (i32, i32, i32) {
    %c0_i32 = arith.constant 0 : i32
    %c0_i32_0 = arith.constant 0 : i32
    return %arg0, %c0_i32, %arg1 : i32, i32, i32
  }
  func.func @transform_1(%arg0: i32, %arg1: i32) -> (i32, i32) {
    %c0_i32 = arith.constant 0 : i32
    %c0_i32_0 = arith.constant 0 : i32
    %c0_i32_1 = arith.constant 0 : i32
    return %c0_i32, %c0_i32_0 : i32, i32
  }
  func.func @transform_2(%arg0: i32, %arg1: i32) -> i32 {
    %c0_i32 = arith.constant 0 : i32
    %c0_i32_0 = arith.constant 0 : i32
    return %c0_i32 : i32
  }
  func.func @transform_3(%arg0: i32, %arg1: i32) -> (i32, i32, i32) {
    %c0_i32 = arith.constant 0 : i32
    %c0_i32_0 = arith.constant 0 : i32
    return %arg0, %c0_i32, %arg1 : i32, i32, i32
  }
}

</mosaic_0001>

<bundles_post_ra>
// kernel: tpu_custom_call.1
= control target key start
LH: loop header
LB: loop body
LE: loop exit
PB: predicated region body
PF: predicated region fallthrough
CT: control target
= control target key end

     0   :  { %8 = vsyncpa [#allocation3], 0  ;;  %s966_s0 = inlined_call_operand.hbm [shape: f32[2,4,256], index: 0, kind: input, shape index: {}]   ;;  %s967_s1 = inlined_call_operand.hbm [shape: f32[3,4], index: 1, kind: input, shape index: {}]   ;;  %s968_s2 = inlined_call_operand.vmem [shape: f32[3], index: 2, kind: input, shape index: {}]   ;;  %s969_s3 = inlined_call_operand.vmem [shape: f32[2,3,256], index: 3, kind: output, shape index: {}]  }
   0x1   :  { %10 = vsyncpa [#allocation3 + $0x1], 0 }
   0x2   :  { %11 = vsyncpa [#allocation4], 0 }
   0x3   :  { %12 = vsyncpa [#allocation5], 0  ;;  %s771_s12 = smov 0   ;;  %s773_s13 = smov 0  }
   0x4   :  { %s775_s14 = smov 0   ;;  %s777_s15 = smov 0  }
   0x5   :  { %s779_s16 = smov 0   ;;  %s781_s17 = smov 0  }
   0x6 LB: > { %s509_s18 = sadd.s32 4294967295, %s745_s17   ;;  %p52_p0 = scmp.ne.s32.totalorder %s729_s13, %s725_s12  ;;  %s745_s17 = sphi %s781_s17, %s18_s17   ;;  %s741_s16 = sphi %s779_s16, %s985_s16   ;;  %s737_s15 = sphi %s777_s15, %s984_s15   ;;  %s733_s14 = sphi %s775_s14, %s983_s14   ;;  %s729_s13 = sphi %s773_s13, %s982_s13   ;;  %s725_s12 = sphi %s771_s12, %s981_s12  }
   0x7   : > { %p801_p1 = scmp.eq.s32.totalorder %s509_s18, 0  ;;  %p511_p2 = scmp.ge.s32.totalorder %s745_s17, 1 }
   0x8   : > { %p133_p3 = scmp.lt.s32.totalorder %s745_s17, 3  ;;  %s155_s24 = sshll.u32 %s968_s2, 4  ;;  %s156_s24 = int_to_ptr.vmem [resolvable:$true] %s155_s24 }
   0x9   : > { %s973_s19 = scalar_select %p801_p1, 1, 0 }
   0xa   : > { %p809_p4 = por %p801_p1, %p52_p0  ;;  %p813_p5 = pnand %p511_p2, %p133_p3 }
   0xb   : > { %s30_s26 = sadd.s32 1, %s741_s16  ;;  %s629_s30 = scalar_lea.hbm %s967_s1, 64 }
   0xc   : > { %s974_s20 = scalar_select %p809_p4, 1, 0 }
   0xd   : > { %p562_p6 = pneg %p813_p5  ;;  %p829_p8 = scmp.ge.s32.totalorder %s30_s26, 2 }
   0xe   : > { %p630_p9 = scmp.ne.s32.totalorder %s967_s1, %s629_s30  ;;  %p636_p13 = scmp.lt.u32.totalorder %s629_s30, %s967_s1 }
   0xf   : > { %p824_p7 = pnand %p562_p6, %p801_p1 }
  0x11   : > { %p631_p10 = pneg %p824_p7 }
  0x13   : > { %p632_p11 = pnand %p631_p10, %p630_p9 }
  0x15   : > { %p633_p12 = pneg %p632_p11 }
  0x17   : > { %p638_p0 = pnand %p636_p13, %p633_p12 }
  0x19   : > { %641 = shalt.err (!%p638_p0)
}
  0x1a   : > { %s747_s8 = smov [#allocation6]   ;;  %s642_s11 = scalar_lea.vmem %s156_s24, 16 }
  0x1b   : > { %565 = dma.hbm_to_smem (!%p824_p7), %s967_s1, 64, %s747_s8, [#allocation4]  }
  0x1c   : > { %p643_p2 = scmp.ne.s32.totalorder %s156_s24, %s642_s11  ;;  %p650_p1 = scmp.lt.s32.totalorder %s156_s24, %s156_s24 }
  0x1d   : > { %p651_p9 = scmp.lt.s32.totalorder %s642_s11, %s642_s11 }
  0x1e   : > { %p645_p3 = pnand %p643_p2, %p631_p10 }
  0x1f   : > { %p652_p11 = por %p651_p9, %p650_p1 }
  0x20   : > { %p646_p6 = pneg %p645_p3 }
  0x22   : > { %p653_p4 = pnand %p652_p11, %p646_p6 }
  0x24   : > { %656 = shalt.err (!%p653_p4)
}
  0x25   : > { %s748_s12 = smov [#allocation7]   ;;  %s987_s26 = smov (%p829_p8, %s30_s26), 0 }
  0x26   : > { %568 = dma.vmem_to_smem (!%p824_p7), %s156_s24, 16, %s748_s12, [#allocation5]  }
  0x27   : > { %s39_s18 = sadd.s32 1, %s733_s14  ;;  %p46_p1 = scmp.ne.s32.totalorder %s733_s14, %s729_s13 }
  0x28   : > { %s34_s22 = ssub.s32 %s741_s16, %s987_s26  ;;  %p47_p4 = scmp.eq.s32.totalorder %s745_s17, 0 }
  0x29   : > { %p37_p10 = scmp.eq.s32.totalorder %s34_s22, 0  ;;  %p575_p12 = scmp.lt.s32.totalorder %s745_s17, 2 }
  0x2a   : > { %p48_p13 = por %p47_p4, %p46_p1  ;;  %s166_s23 = sand.u32 1, %s733_s14  }
  0x2b   : > { %s864_s25 = scalar_select %p37_p10, %s733_s14, %s39_s18  }
  0x2c   : > { %s515_s28 = sshll.u32 %s166_s23, 3  ;;  %s550_s29 = sshll.u32 %s741_s16, 7 }
  0x2d   : > { %s870_s24 = scalar_lea.hbm %s966_s0, %s550_s29  ;;  %s170_s27 = scalar_lea.vmem [#allocation2], %s515_s28 }
  0x2e   : > { %s180_s5 = sshll.u32 %s170_s27, 4  ;;  %p874_p7 = pnand %p575_p12, %p48_p13  ;;  %s872_s5 = int_to_ptr.vmem [resolvable:$true] %s180_s5 }
  0x2f   : > { %s167_s7 = scalar_lea.sflag [#allocation3], %s166_s23  ;;  %s657_s8 = scalar_lea.hbm %s870_s24, 128 }
  0x30   : > { %p658_p8 = scmp.ne.s32.totalorder %s870_s24, %s657_s8  ;;  %p659_p0 = pneg %p874_p7 }
  0x31   : > { %s662_s11 = scalar_lea.hbm %s966_s0, 256  ;;  %p663_p6 = scmp.lt.u32.totalorder %s870_s24, %s966_s0 }
  0x32   : > { %p660_p2 = pnand %p659_p0, %p658_p8  ;;  %p664_p9 = scmp.lt.u32.totalorder %s662_s11, %s657_s8 }
  0x33   : > { %p666_p1 = scmp.lt.u32.totalorder %s657_s8, %s870_s24 }
  0x34   : > { %p661_p3 = pneg %p660_p2  ;;  %p665_p11 = por %p664_p9, %p663_p6 }
  0x36   : > { %p667_p4 = por %p666_p1, %p665_p11 }
  0x38   : > { %p668_p10 = pnand %p667_p4, %p661_p3 }
  0x3a   : > { %671 = shalt.err (!%p668_p10)
}
  0x3b   : > { %s672_s22 = scalar_lea.vmem %s872_s5, 128  ;;  %s749_s23 = smov [#allocation2]  }
  0x3c   : > { %p673_p12 = scmp.ne.s32.totalorder %s872_s5, %s672_s22  ;;  %s677_s28 = sshll.u32 %s749_s23, 4  ;;  %s678_s28 = int_to_ptr.vmem [resolvable:$false] %s677_s28 }
  0x3d   : > { %s679_s29 = scalar_lea.vmem %s678_s28, 256  ;;  %p680_p2 = scmp.lt.s32.totalorder %s872_s5, %s678_s28 }
  0x3e   : > { %p675_p13 = pnand %p673_p12, %p659_p0  ;;  %p681_p6 = scmp.lt.s32.totalorder %s679_s29, %s672_s22 }
  0x40   : > { %p676_p8 = pneg %p675_p13  ;;  %p682_p9 = por %p681_p6, %p680_p2 }
  0x42   : > { %p683_p11 = pnand %p682_p9, %p676_p8 }
  0x44   : > { %686 = shalt.err (!%p683_p11)
}
  0x45   : > { %572 = dma.hbm_to_vmem [thread:$0]  (!%p874_p7), %s870_s24, 128, %s872_s5, %s167_s7  }
  0x46   : > { %189 = sbr.rel (%p813_p5) target bundleno = 115 (0x73), region = 32  ;;  %s191_s30 = sand.u32 (!%p813_p5), 1, %s729_s13  }
  0x47   : > { %s519_s4 = sshll.u32 (!%p813_p5), %s191_s30, 3  ;;  %s192_s27 = scalar_lea.sflag (!%p813_p5), [#allocation3], %s191_s30 }
  0x48   : > { %s195_s8 = scalar_lea.vmem (!%p813_p5), [#allocation2], %s519_s4  ;;  %p979_p0 = scmp.ne.s32.totalorder (!%p813_p5), %s974_s20, 0 }
  0x4d   : > { %712 = dma.done.wait (%p979_p0), %s192_s27, 128  }
  0x4e   : > { %714 = vsyncadd (%p979_p0), %s192_s27, 4294967168  ;;  %p980_p3 = scmp.ne.s32.totalorder %s973_s19, 0 }
  0x50   : > { %716 = dma.done.wait (%p980_p3), [#allocation4], 64  }
  0x51   : > { %718 = vsyncadd (%p980_p3), [#allocation4], 4294967232 }
  0x52   : > { %720 = dma.done.wait (%p980_p3), [#allocation5], 16  }
  0x53   : > { %722 = vsyncadd (%p980_p3), [#allocation5], 4294967280 }
  0x54   : > { %208 = sfence }
  0x55   : > { %s243_s21 = sld [smem:[#allocation6]]  ;;  %s524_s5 = sld [smem:[#allocation6 + $0x1]]  ;;  %v277_v0 = vlaneseq  ;;  %v750_v1 = vmov 1966171168   ;;  %v242_v3 = vld [vmem:[%s195_s8] sm:$0xff] }
  0x56   : > { %s246_s24 = sld [smem:[#allocation7]]  ;;  %s526_s20 = sld [smem:[#allocation6 + $0x2]]  ;;  %v275_v2 = vunpack.c.l.s4 %v750_v1 }
  0x57   : > { %s528_s6 = sld [smem:[#allocation6 + $0x3]]  ;;  %s530_s7 = sld [smem:[#allocation6 + $0x80]]  ;;  %v278_v5 = vshrl.u32 %v277_v0, 7  ;;  %vm291_vm0 = vcmp.lt.s32.totalorder %v277_v0, 256 }
  0x58   : > { %p233_p5 = scmp.lt.s32.totalorder %s737_s15, 1  ;;  %s919_s9 = sld [smem:[#allocation7 + $0x1]]  ;;  %v276_v9 = vunpack.c.0.s8 %v275_v2 }
  0x59   : > { %s532_s19 = sld [smem:[#allocation6 + $0x81]]  ;;  %s922_s10 = sld [smem:[#allocation6 + $0x82]] }
  0x5a   : > { %s536_s11 = sld [smem:[#allocation6 + $0x83]]  ;;  %s539_s12 = sld [smem:[#allocation6 + $0x100]]  ;;  %v279_v18 = vsub.s32 %v276_v9, %v278_v5 }
  0x5b   : > { %v244_v4 = vstv %s243_s21  ;;  %v250_v8 = vstv %s524_s5  ;;  %s924_s18 = sld [smem:[#allocation7 + $0x2]]  ;;  %s926_s22 = sld [smem:[#allocation6 + $0x101]] }
  0x5c   : > { %v245_v6 = vmul.f32 %v244_v4, %v242_v3  ;;  %v247_v7 = vstv %s246_s24  ;;  %v251_v10 = vmul.f32 %v250_v8, %v242_v3  ;;  %v258_v12 = vstv %s526_s20  ;;  %s928_s23 = sld [smem:[#allocation6 + $0x102]]  ;;  %s930_s28 = sld [smem:[#allocation6 + $0x103]] }
  0x5d   : > { %v266_v13 = vstv %s528_s6  ;;  %v259_v15 = vmul.f32 %v258_v12, %v242_v3  ;;  %v295_v17 = vstv %s530_s7  ;;  %s989_s15 = smov (!%p233_p5, %s737_s15), 1 }
  0x5e   : > { %v248_v11 = vadd.f32 %v247_v7, %v245_v6  ;;  %v525_v14 = vrot.slane %v251_v10, 9  ;;  %v267_v16 = vmul.f32 %v266_v13, %v242_v3  ;;  %v296_v19 = vmul.f32 %v295_v17, %v242_v3  ;;  %s551_s29 = sshll.u32 %s989_s15, 3 }
  0x5f   : > { %v298_v20 = vstv %s919_s9  ;;  %v527_v22 = vrot.slane %v259_v15, 10  ;;  %v301_v24 = vstv %s532_s19  ;;  %v309_v27 = vstv %s922_s10  ;;  %s240_s27 = scalar_lea.vmem %s969_s3, %s551_s29 }
  0x60   : > { %v256_v21 = vadd.f32 %v525_v14, %v248_v11  ;;  %v529_v23 = vrot.slane %v267_v16, 11  ;;  %v299_v25 = vadd.f32 %v298_v20, %v296_v19  ;;  %v302_v26 = vmul.f32 %v301_v24, %v242_v3 }
  0x61   : > { %v317_v28 = vstv %s536_s11  ;;  %v310_v30 = vmul.f32 %v309_v27, %v242_v3  ;;  %v343_v32 = vstv %s539_s12  ;;  %v346_v35 = vstv %s924_s18 }
  0x62   : > { %v264_v29 = vadd.f32 %v527_v22, %v256_v21  ;;  %v318_v31 = vmul.f32 %v317_v28, %v242_v3  ;;  %v533_v33 = vrot.slane %v302_v26, 9  ;;  %v344_v34 = vmul.f32 %v343_v32, %v242_v3 }
  0x63   : > { %v349_v36 = vstv %s926_s22  ;;  %v535_v38 = vrot.slane %v310_v30, 10  ;;  %v357_v43 = vstv %s928_s23  ;;  %v365_v44 = vstv %s930_s28 }
  0x64   : > { %v272_v37 = vadd.f32 %v529_v23, %v264_v29  ;;  %v537_v39 = vrot.slane %v318_v31, 11  ;;  %v350_v40 = vmul.f32 %v349_v36, %v242_v3  ;;  %v307_v41 = vadd.f32 %v533_v33, %v299_v25 }
  0x65   : > { %v347_v42 = vadd.f32 %v346_v35, %v344_v34  ;;  %v358_v47 = vmul.f32 %v357_v43, %v242_v3  ;;  %v366_v48 = vmul.f32 %v365_v44, %v242_v3 }
  0x66   : > { %v280_v45 = vrot.slane %v272_v37, %v279_v18  ;;  %v542_v46 = vrot.slane %v350_v40, 9  ;;  %v315_v49 = vadd.f32 %v535_v38, %v307_v41 }
  0x67   : > { %v544_v52 = vrot.slane %v358_v47, 10  ;;  %v546_v53 = vrot.slane %v366_v48, 11 }
  0x68   : > { %v287_v50 = vrot.slane %v280_v45, %v279_v18  ;;  %v355_v51 = vadd.f32 %v542_v46, %v347_v42  ;;  %v323_v54 = vadd.f32 %v537_v39, %v315_v49 }
  0x6a   : > { %293 = vst.msk [vmem:[%s240_s27] ss:$4 sm:$0x3] %vm291_vm0, %v287_v50  ;;  %v363_v55 = vadd.f32 %v544_v52, %v355_v51  ;;  %v331_v56 = vrot.slane %v323_v54, %v279_v18 }
  0x6c   : > { %v371_v57 = vadd.f32 %v546_v53, %v363_v55  ;;  %v338_v58 = vrot.slane %v331_v56, %v279_v18 }
  0x6e   : > { %v379_v59 = vrot.slane %v371_v57, %v279_v18  ;;  %538 = vst.msk [vmem:[%s240_s27 + $0x1] ss:$4 sm:$0x3] %vm291_vm0, %v338_v58 }
  0x70   : > { %v386_v60 = vrot.slane %v379_v59, %v279_v18 }
  0x72   : > { %547 = vst.msk [vmem:[%s240_s27 + $0x2] ss:$4 sm:$0x3] %vm291_vm0, %v386_v60 }
  0x73 PF: > { %s18_s17 = sadd.s32 1, %s745_s17   ;;  %s981_s12 = smov %s729_s13 }
  0x74   : > { %p15_p7 = scmp.ge.s32.totalorder %s18_s17, 4   ;;  %s982_s13 = smov %s733_s14 }
  0x75   : > { %s983_s14 = smov %s864_s25  ;;  %s984_s15 = smov %s741_s16 }
  0x76   : > { %s985_s16 = smov %s987_s26  ;;  %17 = sbr.rel (!%p15_p7) target bundleno = 6 (0x6), region = 84 }
  0x7d   :  { %420 = vsyncpa [#allocation3], 1 }
  0x7e   :  { %422 = vsyncpa [#allocation3 + $0x1], 1 }
  0x7f   :  { %423 = vsyncpa [#allocation4], 1 }
  0x80   :  { %425 = vsyncpa [#allocation4 + $0x1], 1 }
  0x81   :  { %426 = vsyncpa [#allocation5], 1 }
  0x82   :  { %428 = vsyncpa [#allocation5 + $0x1], 1 }

</bundles_post_ra>
